<compile_context>
chip_gen: v6e
topology: v6e:2x2x1
jax: 0.10.0
libtpu: 0.0.40
codegen_flags: <defaults>
</compile_context>

<pallas_src>
import functools
import math

import jax
import jax.numpy as jnp
from jax.experimental import pallas as pl
from jax.experimental.pallas import tpu as pltpu

LN_EPS = 1e-5
SELU_ALPHA = 1.6732632423543772
SELU_SCALE = 1.0507009873554805


def _round_up(x, m):
    return ((x + m - 1) // m) * m


def _lane_pad(c, lane=128, max_per=16):
    """Smallest padded channel width cp >= c whose packing factor
    per = lane // gcd(cp, lane) satisfies per <= max_per.  Returns (cp, per)."""
    best = None
    for align in (1, 8, 16, 32, 64, lane):
        cp = _round_up(c, align)
        per = lane // math.gcd(cp, lane)
        if per <= max_per and (best is None or cp < best[0]):
            best = (cp, per)
    return best


def _fused_block(x, w, b, gamma, beta):
    """Linear -> LayerNorm -> SELU (dropout = identity at inference).

    MXU operands use w.dtype (bf16 by default); accumulation + LN stats in f32.
    """
    y = jnp.dot(x.astype(w.dtype), w, preferred_element_type=jnp.float32)
    y = y + b
    mu = jnp.mean(y, axis=-1, keepdims=True)
    d = y - mu                                  # centered (two-pass) stats
    var = jnp.mean(d * d, axis=-1, keepdims=True)
    y = d * jax.lax.rsqrt(var + LN_EPS)
    y = y * gamma + beta
    return SELU_SCALE * jnp.where(y > 0, y, SELU_ALPHA * (jnp.exp(y) - 1.0))


def forward_pool_kernel(x_ref,
                        w1_ref, b1_ref, g1_ref, be1_ref,
                        w2_ref, b2_ref, g2_ref, be2_ref,
                        w3_ref, b3_ref, g3_ref, be3_ref,
                        o_ref, *, pack, c_in, c_out, c_out_pad, tile_g):
    # Read every parameter exactly once per grid step.
    w1, b1, g1, be1 = w1_ref[...], b1_ref[...], g1_ref[...], be1_ref[...]
    w2, b2, g2, be2 = w2_ref[...], b2_ref[...], g2_ref[...], be2_ref[...]
    w3, b3, g3, be3 = w3_ref[...], b3_ref[...], g3_ref[...], be3_ref[...]

    # One full-width (lane-dense) load, then a single de-interleave pass:
    # the `pack` lane slots are stacked along the sublane (row) axis so each
    # layer runs as ONE matmul over pack*tile_g rows.  Rows are permuted
    # consistently between input and output; all ops are purely row-wise.
    x_full = x_ref[...].astype(jnp.float32)
    if pack > 1:
        x = jnp.concatenate(
            [x_full[:, p * c_in:(p + 1) * c_in] for p in range(pack)], axis=0)
    else:
        x = x_full

    h = _fused_block(x, w1, b1, g1, be1)
    h = _fused_block(h, w2, b2, g2, be2)
    h = _fused_block(h, w3, b3, g3, be3)

    # Zero-pad output channels (if any) AFTER LayerNorm/SELU so stats are exact.
    if c_out_pad > c_out:
        h = jnp.concatenate(
            [h, jnp.zeros((h.shape[0], c_out_pad - c_out), h.dtype)], axis=1)

    # Single re-interleave pass + one full-width (lane-dense) store.
    if pack > 1:
        out = jnp.concatenate(
            [h[p * tile_g:(p + 1) * tile_g, :] for p in range(pack)], axis=1)
    else:
        out = h
    o_ref[...] = out.astype(o_ref.dtype)


def forward_pool(x, params, *, tile_m=2048, matmul_dtype=jnp.bfloat16,
                 min_grid_steps=2):
    """x: (B, S, C_in).  params: list of 3 tuples (w, b, gamma, beta).

    matmul_dtype: MXU operand dtype (accumulation is always f32).  bf16 is
    MXU-native on v5e/v6e/v7x; pass None for bit-tight f32 operands.
    """
    B, S, C_in = x.shape
    M = B * S
    (w1, b1, g1, be1), (w2, b2, g2, be2), (w3, b3, g3, be3) = params
    C_out = w3.shape[1]

    # Lane-dense packing: P consecutive rows share one packed row whose width
    # is a multiple of 128 lanes.  Odd channel counts are zero-padded so both
    # I/O slabs stay dense (input cols + w1 rows here; output cols in-kernel).
    c_in_p, per_in = _lane_pad(C_in)
    c_out_p, per_out = _lane_pad(C_out)
    P = per_in * per_out // math.gcd(per_in, per_out)

    if c_in_p != C_in:
        x = jnp.pad(x, ((0, 0), (0, 0), (0, c_in_p - C_in)))
        w1 = jnp.pad(w1, ((0, c_in_p - C_in), (0, 0)))   # zero rows: exact

    if matmul_dtype is not None:
        w1, w2, w3 = (w.astype(matmul_dtype) for w in (w1, w2, w3))

    # Row tiling: big tiles (>=512 KiB DMAs at typical widths), but capped so
    # the grid keeps >= min_grid_steps steps (lets the "parallel" axis shard
    # across v7x's 2 TensorCores; harmless on v5e/v6e).
    unit = 8 * P
    tile_rows = max(unit, min(_round_up(tile_m, unit),
                              _round_up(-(-M // min_grid_steps), unit)))
    Mp = _round_up(M, tile_rows)          # zero-pad ragged tail (benign rows)
    tile_g = tile_rows // P
    grid = (Mp // tile_rows,)

    x2d = x.reshape(M, c_in_p)
    if Mp != M:
        x2d = jnp.pad(x2d, ((0, Mp - M), (0, 0)))
    xp = x2d.reshape(Mp // P, P * c_in_p)   # free, row-major-compatible reshape

    def full_spec(arr):
        # whole-array block, resident across all grid steps
        return pl.BlockSpec(arr.shape, lambda i: (0,) * arr.ndim)

    kernel = functools.partial(
        forward_pool_kernel, pack=P, c_in=c_in_p, c_out=C_out,
        c_out_pad=c_out_p, tile_g=tile_g)

    H1, H2 = w1.shape[1], w2.shape[1]
    param_arrays = (w1, b1, g1, be1, w2, b2, g2, be2, w3, b3, g3, be3)
    cost = pl.CostEstimate(
        flops=2 * Mp * (c_in_p * H1 + H1 * H2 + H2 * C_out),
        transcendentals=Mp * (H1 + H2 + C_out),
        bytes_accessed=(xp.size * xp.dtype.itemsize
                        + Mp * c_out_p * x.dtype.itemsize
                        + sum(a.size * a.dtype.itemsize for a in param_arrays)))

    out_p = pl.pallas_call(
        kernel,
        out_shape=jax.ShapeDtypeStruct((Mp // P, P * c_out_p), x.dtype),
        grid_spec=pltpu.PrefetchScalarGridSpec(
            num_scalar_prefetch=0,
            grid=grid,
            in_specs=[pl.BlockSpec((tile_g, P * c_in_p), lambda i: (i, 0))]
                     + [full_spec(a) for a in param_arrays],
            out_specs=pl.BlockSpec((tile_g, P * c_out_p), lambda i: (i, 0)),
        ),
        compiler_params=pltpu.CompilerParams(
            dimension_semantics=("parallel",)),
        cost_estimate=cost,
    )(xp, *param_arrays)

    out = out_p.reshape(Mp, c_out_p)[:M, :C_out]
    return out.reshape(B, S, C_out)


def init_params(key, in_features, out_features, layers=4, dtype=jnp.float32):
    """Deterministic init mimicking PyTorch defaults (uniform +/- 1/sqrt(fan_in))."""
    intermediate = [in_features * 2 ** i for i in range(1, layers - 1)]
    sizes = [in_features] + intermediate + [out_features]
    params = []
    for i in range(len(sizes) - 1):
        fan_in, fan_out = sizes[i], sizes[i + 1]
        key, kw, kb = jax.random.split(key, 3)
        bound = 1.0 / jnp.sqrt(fan_in)
        w = jax.random.uniform(kw, (fan_in, fan_out), dtype, -bound, bound)
        b = jax.random.uniform(kb, (1, fan_out), dtype, -bound, bound)
        gamma = jnp.ones((1, fan_out), dtype)
        beta = jnp.zeros((1, fan_out), dtype)
        params.append((w, b, gamma, beta))
    return params


def forward_pool_ref(x, params):
    """Pure-JAX reference (two-pass LN, like PyTorch)."""
    B, S, C = x.shape
    h = x.reshape(B * S, C).astype(jnp.float32)
    for (w, b, g, be) in params:
        y = h @ w + b
        mu = jnp.mean(y, axis=-1, keepdims=True)
        var = jnp.mean((y - mu) ** 2, axis=-1, keepdims=True)
        y = (y - mu) / jnp.sqrt(var + LN_EPS)
        y = y * g + be
        h = SELU_SCALE * jnp.where(y > 0, y, SELU_ALPHA * (jnp.exp(y) - 1.0))
    return h.reshape(B, S, -1).astype(x.dtype)


if __name__ == "__main__":
    key = jax.random.PRNGKey(0)
    k_x, k_p, k_x2, k_p2 = jax.random.split(key, 4)

    B, S = 2, 8

    # --- test 1: f32 MXU operands, exactly packable channels (32->64->128->32)
    in_f, out_f = 32, 32
    x = jax.random.normal(k_x, (B, S, in_f), jnp.float32)
    params = init_params(k_p, in_f, out_f, layers=4)
    out = jax.block_until_ready(forward_pool(x, params, matmul_dtype=None))
    ref = forward_pool_ref(x, params)
    assert out.shape == (B, S, out_f)
    assert jnp.allclose(out, ref, atol=1e-4, rtol=1e-4), "f32 path mismatch"

    # --- test 2: default bf16 MXU operands (f32 accumulation), looser tolerance
    out_bf = jax.block_until_ready(forward_pool(x, params))
    assert out_bf.shape == (B, S, out_f)
    assert jnp.allclose(out_bf, ref, atol=5e-2, rtol=5e-2), "bf16 path mismatch"

    # --- test 3: odd channel counts (60->120->240->60) exercising the
    # channel zero-padding fallback (input cols / w1 rows / output cols).
    in_f2, out_f2 = 60, 60
    x2 = jax.random.normal(k_x2, (B, S, in_f2), jnp.float32)
    params2 = init_params(k_p2, in_f2, out_f2, layers=4)
    out2 = jax.block_until_ready(forward_pool(x2, params2, matmul_dtype=None))
    ref2 = forward_pool_ref(x2, params2)
    assert out2.shape == (B, S, out_f2)
    assert jnp.allclose(out2, ref2, atol=1e-4, rtol=1e-4), "padded path mismatch"

    print("KERNEL_OK")
</pallas_src>

<mosaic_0001>
module attributes {stable_mosaic.version = 11 : i64} {
  func.func @forward_pool_kernel(%arg0: i32, %arg1: memref<8x128xf32, #tpu.memory_space<vmem>>, %arg2: memref<32x64xf32, #tpu.memory_space<vmem>>, %arg3: memref<1x64xf32, #tpu.memory_space<vmem>>, %arg4: memref<1x64xf32, #tpu.memory_space<vmem>>, %arg5: memref<1x64xf32, #tpu.memory_space<vmem>>, %arg6: memref<64x128xf32, #tpu.memory_space<vmem>>, %arg7: memref<1x128xf32, #tpu.memory_space<vmem>>, %arg8: memref<1x128xf32, #tpu.memory_space<vmem>>, %arg9: memref<1x128xf32, #tpu.memory_space<vmem>>, %arg10: memref<128x32xf32, #tpu.memory_space<vmem>>, %arg11: memref<1x32xf32, #tpu.memory_space<vmem>>, %arg12: memref<1x32xf32, #tpu.memory_space<vmem>>, %arg13: memref<1x32xf32, #tpu.memory_space<vmem>>, %arg14: memref<8x128xf32, #tpu.memory_space<vmem>>) attributes {dimension_semantics = [#tpu.dimension_semantics<parallel>], iteration_bounds = array<i64: 1>, scalar_prefetch = 0 : i64, scratch_operands = 0 : i64, tpu.core_type = #tpu.core_type<tc>, window_params = [{transform_indices = @transform_0, window_bounds = array<i64: 8, 128>}, {pipeline_mode = #tpu.pipeline_mode<synchronous>, transform_indices = @transform_1, window_bounds = array<i64: 32, 64>}, {pipeline_mode = #tpu.pipeline_mode<synchronous>, transform_indices = @transform_2, window_bounds = array<i64: 1, 64>}, {pipeline_mode = #tpu.pipeline_mode<synchronous>, transform_indices = @transform_3, window_bounds = array<i64: 1, 64>}, {pipeline_mode = #tpu.pipeline_mode<synchronous>, transform_indices = @transform_4, window_bounds = array<i64: 1, 64>}, {pipeline_mode = #tpu.pipeline_mode<synchronous>, transform_indices = @transform_5, window_bounds = array<i64: 64, 128>}, {pipeline_mode = #tpu.pipeline_mode<synchronous>, transform_indices = @transform_6, window_bounds = array<i64: 1, 128>}, {pipeline_mode = #tpu.pipeline_mode<synchronous>, transform_indices = @transform_7, window_bounds = array<i64: 1, 128>}, {pipeline_mode = #tpu.pipeline_mode<synchronous>, transform_indices = @transform_8, window_bounds = array<i64: 1, 128>}, {pipeline_mode = #tpu.pipeline_mode<synchronous>, transform_indices = @transform_9, window_bounds = array<i64: 128, 32>}, {pipeline_mode = #tpu.pipeline_mode<synchronous>, transform_indices = @transform_10, window_bounds = array<i64: 1, 32>}, {pipeline_mode = #tpu.pipeline_mode<synchronous>, transform_indices = @transform_11, window_bounds = array<i64: 1, 32>}, {pipeline_mode = #tpu.pipeline_mode<synchronous>, transform_indices = @transform_12, window_bounds = array<i64: 1, 32>}, {transform_indices = @transform_13, window_bounds = array<i64: 8, 128>}]} {
    %c0 = arith.constant 0 : index
    %c0_0 = arith.constant 0 : index
    %0 = vector.load %arg2[%c0, %c0_0] : memref<32x64xf32, #tpu.memory_space<vmem>>, vector<32x64xf32>
    %c0_1 = arith.constant 0 : index
    %c0_2 = arith.constant 0 : index
    %1 = vector.load %arg3[%c0_1, %c0_2] : memref<1x64xf32, #tpu.memory_space<vmem>>, vector<1x64xf32>
    %c0_3 = arith.constant 0 : index
    %c0_4 = arith.constant 0 : index
    %2 = vector.load %arg4[%c0_3, %c0_4] : memref<1x64xf32, #tpu.memory_space<vmem>>, vector<1x64xf32>
    %c0_5 = arith.constant 0 : index
    %c0_6 = arith.constant 0 : index
    %3 = vector.load %arg5[%c0_5, %c0_6] : memref<1x64xf32, #tpu.memory_space<vmem>>, vector<1x64xf32>
    %c0_7 = arith.constant 0 : index
    %c0_8 = arith.constant 0 : index
    %4 = vector.load %arg6[%c0_7, %c0_8] : memref<64x128xf32, #tpu.memory_space<vmem>>, vector<64x128xf32>
    %c0_9 = arith.constant 0 : index
    %c0_10 = arith.constant 0 : index
    %5 = vector.load %arg7[%c0_9, %c0_10] : memref<1x128xf32, #tpu.memory_space<vmem>>, vector<1x128xf32>
    %c0_11 = arith.constant 0 : index
    %c0_12 = arith.constant 0 : index
    %6 = vector.load %arg8[%c0_11, %c0_12] : memref<1x128xf32, #tpu.memory_space<vmem>>, vector<1x128xf32>
    %c0_13 = arith.constant 0 : index
    %c0_14 = arith.constant 0 : index
    %7 = vector.load %arg9[%c0_13, %c0_14] : memref<1x128xf32, #tpu.memory_space<vmem>>, vector<1x128xf32>
    %c0_15 = arith.constant 0 : index
    %c0_16 = arith.constant 0 : index
    %8 = vector.load %arg10[%c0_15, %c0_16] : memref<128x32xf32, #tpu.memory_space<vmem>>, vector<128x32xf32>
    %c0_17 = arith.constant 0 : index
    %c0_18 = arith.constant 0 : index
    %9 = vector.load %arg11[%c0_17, %c0_18] : memref<1x32xf32, #tpu.memory_space<vmem>>, vector<1x32xf32>
    %c0_19 = arith.constant 0 : index
    %c0_20 = arith.constant 0 : index
    %10 = vector.load %arg12[%c0_19, %c0_20] : memref<1x32xf32, #tpu.memory_space<vmem>>, vector<1x32xf32>
    %c0_21 = arith.constant 0 : index
    %c0_22 = arith.constant 0 : index
    %11 = vector.load %arg13[%c0_21, %c0_22] : memref<1x32xf32, #tpu.memory_space<vmem>>, vector<1x32xf32>
    %c0_23 = arith.constant 0 : index
    %c0_24 = arith.constant 0 : index
    %12 = vector.load %arg1[%c0_23, %c0_24] : memref<8x128xf32, #tpu.memory_space<vmem>>, vector<8x128xf32>
    %13 = vector.extract_strided_slice %12 {offsets = [0, 0], sizes = [8, 32], strides = [1, 1]} : vector<8x128xf32> to vector<8x32xf32>
    %14 = vector.extract_strided_slice %12 {offsets = [0, 32], sizes = [8, 32], strides = [1, 1]} : vector<8x128xf32> to vector<8x32xf32>
    %15 = vector.extract_strided_slice %12 {offsets = [0, 64], sizes = [8, 32], strides = [1, 1]} : vector<8x128xf32> to vector<8x32xf32>
    %16 = vector.extract_strided_slice %12 {offsets = [0, 96], sizes = [8, 32], strides = [1, 1]} : vector<8x128xf32> to vector<8x32xf32>
    %17 = tpu.concatenate %13, %14, %15, %16 in 0 : vector<8x32xf32>, vector<8x32xf32>, vector<8x32xf32>, vector<8x32xf32> -> vector<32x32xf32>
    %cst = arith.constant dense<0.000000e+00> : vector<32x64xf32>
    %18 = tpu.matmul %17, %0, %cst {dimension_numbers = #tpu.dot_dimension_numbers<[1], [0], [0], [1], [0, 0, 1, 1], [], []>} : vector<32x32xf32>, vector<32x64xf32>, vector<32x64xf32> -> vector<32x64xf32>
    %19 = vector.broadcast %1 : vector<1x64xf32> to vector<32x64xf32>
    %20 = arith.addf %18, %19 : vector<32x64xf32>
    %cst_25 = arith.constant dense<0.000000e+00> : vector<32xf32>
    %21 = vector.multi_reduction <add>, %20, %cst_25 [1] : vector<32x64xf32> to vector<32xf32>
    %22 = vector.shape_cast %21 : vector<32xf32> to vector<32x1xf32>
    %cst_26 = arith.constant 6.400000e+01 : f32
    %23 = vector.broadcast %cst_26 : f32 to vector<32x1xf32>
    %24 = arith.divf %22, %23 : vector<32x1xf32>
    %25 = vector.broadcast %24 : vector<32x1xf32> to vector<32x64xf32>
    %26 = arith.subf %20, %25 : vector<32x64xf32>
    %27 = arith.mulf %26, %26 : vector<32x64xf32>
    %cst_27 = arith.constant dense<0.000000e+00> : vector<32xf32>
    %28 = vector.multi_reduction <add>, %27, %cst_27 [1] : vector<32x64xf32> to vector<32xf32>
    %29 = vector.shape_cast %28 : vector<32xf32> to vector<32x1xf32>
    %cst_28 = arith.constant 6.400000e+01 : f32
    %30 = vector.broadcast %cst_28 : f32 to vector<32x1xf32>
    %31 = arith.divf %29, %30 : vector<32x1xf32>
    %cst_29 = arith.constant 9.99999974E-6 : f32
    %32 = vector.broadcast %cst_29 : f32 to vector<32x1xf32>
    %33 = arith.addf %31, %32 : vector<32x1xf32>
    %34 = math.rsqrt %33 : vector<32x1xf32>
    %35 = vector.broadcast %34 : vector<32x1xf32> to vector<32x64xf32>
    %36 = arith.mulf %26, %35 : vector<32x64xf32>
    %37 = vector.broadcast %2 : vector<1x64xf32> to vector<32x64xf32>
    %38 = arith.mulf %36, %37 : vector<32x64xf32>
    %39 = vector.broadcast %3 : vector<1x64xf32> to vector<32x64xf32>
    %40 = arith.addf %38, %39 : vector<32x64xf32>
    %cst_30 = arith.constant 0.000000e+00 : f32
    %41 = vector.broadcast %cst_30 : f32 to vector<32x64xf32>
    %42 = arith.cmpf ogt, %40, %41 : vector<32x64xf32>
    %43 = math.exp %40 : vector<32x64xf32>
    %cst_31 = arith.constant 1.000000e+00 : f32
    %44 = vector.broadcast %cst_31 : f32 to vector<32x64xf32>
    %45 = arith.subf %43, %44 : vector<32x64xf32>
    %cst_32 = arith.constant 1.67326319 : f32
    %46 = vector.broadcast %cst_32 : f32 to vector<32x64xf32>
    %47 = arith.mulf %46, %45 : vector<32x64xf32>
    %48 = arith.select %42, %40, %47 : vector<32x64xi1>, vector<32x64xf32>
    %cst_33 = arith.constant 1.05070102 : f32
    %49 = vector.broadcast %cst_33 : f32 to vector<32x64xf32>
    %50 = arith.mulf %49, %48 : vector<32x64xf32>
    %cst_34 = arith.constant dense<0.000000e+00> : vector<32x128xf32>
    %51 = tpu.matmul %50, %4, %cst_34 {dimension_numbers = #tpu.dot_dimension_numbers<[1], [0], [0], [1], [0, 0, 1, 1], [], []>} : vector<32x64xf32>, vector<64x128xf32>, vector<32x128xf32> -> vector<32x128xf32>
    %52 = vector.broadcast %5 : vector<1x128xf32> to vector<32x128xf32>
    %53 = arith.addf %51, %52 : vector<32x128xf32>
    %cst_35 = arith.constant dense<0.000000e+00> : vector<32xf32>
    %54 = vector.multi_reduction <add>, %53, %cst_35 [1] : vector<32x128xf32> to vector<32xf32>
    %55 = vector.shape_cast %54 : vector<32xf32> to vector<32x1xf32>
    %cst_36 = arith.constant 1.280000e+02 : f32
    %56 = vector.broadcast %cst_36 : f32 to vector<32x1xf32>
    %57 = arith.divf %55, %56 : vector<32x1xf32>
    %58 = vector.broadcast %57 : vector<32x1xf32> to vector<32x128xf32>
    %59 = arith.subf %53, %58 : vector<32x128xf32>
    %60 = arith.mulf %59, %59 : vector<32x128xf32>
    %cst_37 = arith.constant dense<0.000000e+00> : vector<32xf32>
    %61 = vector.multi_reduction <add>, %60, %cst_37 [1] : vector<32x128xf32> to vector<32xf32>
    %62 = vector.shape_cast %61 : vector<32xf32> to vector<32x1xf32>
    %cst_38 = arith.constant 1.280000e+02 : f32
    %63 = vector.broadcast %cst_38 : f32 to vector<32x1xf32>
    %64 = arith.divf %62, %63 : vector<32x1xf32>
    %cst_39 = arith.constant 9.99999974E-6 : f32
    %65 = vector.broadcast %cst_39 : f32 to vector<32x1xf32>
    %66 = arith.addf %64, %65 : vector<32x1xf32>
    %67 = math.rsqrt %66 : vector<32x1xf32>
    %68 = vector.broadcast %67 : vector<32x1xf32> to vector<32x128xf32>
    %69 = arith.mulf %59, %68 : vector<32x128xf32>
    %70 = vector.broadcast %6 : vector<1x128xf32> to vector<32x128xf32>
    %71 = arith.mulf %69, %70 : vector<32x128xf32>
    %72 = vector.broadcast %7 : vector<1x128xf32> to vector<32x128xf32>
    %73 = arith.addf %71, %72 : vector<32x128xf32>
    %cst_40 = arith.constant 0.000000e+00 : f32
    %74 = vector.broadcast %cst_40 : f32 to vector<32x128xf32>
    %75 = arith.cmpf ogt, %73, %74 : vector<32x128xf32>
    %76 = math.exp %73 : vector<32x128xf32>
    %cst_41 = arith.constant 1.000000e+00 : f32
    %77 = vector.broadcast %cst_41 : f32 to vector<32x128xf32>
    %78 = arith.subf %76, %77 : vector<32x128xf32>
    %cst_42 = arith.constant 1.67326319 : f32
    %79 = vector.broadcast %cst_42 : f32 to vector<32x128xf32>
    %80 = arith.mulf %79, %78 : vector<32x128xf32>
    %81 = arith.select %75, %73, %80 : vector<32x128xi1>, vector<32x128xf32>
    %cst_43 = arith.constant 1.05070102 : f32
    %82 = vector.broadcast %cst_43 : f32 to vector<32x128xf32>
    %83 = arith.mulf %82, %81 : vector<32x128xf32>
    %cst_44 = arith.constant dense<0.000000e+00> : vector<32x32xf32>
    %84 = tpu.matmul %83, %8, %cst_44 {dimension_numbers = #tpu.dot_dimension_numbers<[1], [0], [0], [1], [0, 0, 1, 1], [], []>} : vector<32x128xf32>, vector<128x32xf32>, vector<32x32xf32> -> vector<32x32xf32>
    %85 = vector.broadcast %9 : vector<1x32xf32> to vector<32x32xf32>
    %86 = arith.addf %84, %85 : vector<32x32xf32>
    %cst_45 = arith.constant dense<0.000000e+00> : vector<32xf32>
    %87 = vector.multi_reduction <add>, %86, %cst_45 [1] : vector<32x32xf32> to vector<32xf32>
    %88 = vector.shape_cast %87 : vector<32xf32> to vector<32x1xf32>
    %cst_46 = arith.constant 3.200000e+01 : f32
    %89 = vector.broadcast %cst_46 : f32 to vector<32x1xf32>
    %90 = arith.divf %88, %89 : vector<32x1xf32>
    %91 = vector.broadcast %90 : vector<32x1xf32> to vector<32x32xf32>
    %92 = arith.subf %86, %91 : vector<32x32xf32>
    %93 = arith.mulf %92, %92 : vector<32x32xf32>
    %cst_47 = arith.constant dense<0.000000e+00> : vector<32xf32>
    %94 = vector.multi_reduction <add>, %93, %cst_47 [1] : vector<32x32xf32> to vector<32xf32>
    %95 = vector.shape_cast %94 : vector<32xf32> to vector<32x1xf32>
    %cst_48 = arith.constant 3.200000e+01 : f32
    %96 = vector.broadcast %cst_48 : f32 to vector<32x1xf32>
    %97 = arith.divf %95, %96 : vector<32x1xf32>
    %cst_49 = arith.constant 9.99999974E-6 : f32
    %98 = vector.broadcast %cst_49 : f32 to vector<32x1xf32>
    %99 = arith.addf %97, %98 : vector<32x1xf32>
    %100 = math.rsqrt %99 : vector<32x1xf32>
    %101 = vector.broadcast %100 : vector<32x1xf32> to vector<32x32xf32>
    %102 = arith.mulf %92, %101 : vector<32x32xf32>
    %103 = vector.broadcast %10 : vector<1x32xf32> to vector<32x32xf32>
    %104 = arith.mulf %102, %103 : vector<32x32xf32>
    %105 = vector.broadcast %11 : vector<1x32xf32> to vector<32x32xf32>
    %106 = arith.addf %104, %105 : vector<32x32xf32>
    %cst_50 = arith.constant 0.000000e+00 : f32
    %107 = vector.broadcast %cst_50 : f32 to vector<32x32xf32>
    %108 = arith.cmpf ogt, %106, %107 : vector<32x32xf32>
    %109 = math.exp %106 : vector<32x32xf32>
    %cst_51 = arith.constant 1.000000e+00 : f32
    %110 = vector.broadcast %cst_51 : f32 to vector<32x32xf32>
    %111 = arith.subf %109, %110 : vector<32x32xf32>
    %cst_52 = arith.constant 1.67326319 : f32
    %112 = vector.broadcast %cst_52 : f32 to vector<32x32xf32>
    %113 = arith.mulf %112, %111 : vector<32x32xf32>
    %114 = arith.select %108, %106, %113 : vector<32x32xi1>, vector<32x32xf32>
    %cst_53 = arith.constant 1.05070102 : f32
    %115 = vector.broadcast %cst_53 : f32 to vector<32x32xf32>
    %116 = arith.mulf %115, %114 : vector<32x32xf32>
    %117 = vector.extract_strided_slice %116 {offsets = [0, 0], sizes = [8, 32], strides = [1, 1]} : vector<32x32xf32> to vector<8x32xf32>
    %118 = vector.extract_strided_slice %116 {offsets = [8, 0], sizes = [8, 32], strides = [1, 1]} : vector<32x32xf32> to vector<8x32xf32>
    %119 = vector.extract_strided_slice %116 {offsets = [16, 0], sizes = [8, 32], strides = [1, 1]} : vector<32x32xf32> to vector<8x32xf32>
    %120 = vector.extract_strided_slice %116 {offsets = [24, 0], sizes = [8, 32], strides = [1, 1]} : vector<32x32xf32> to vector<8x32xf32>
    %121 = tpu.concatenate %117, %118, %119, %120 in 1 : vector<8x32xf32>, vector<8x32xf32>, vector<8x32xf32>, vector<8x32xf32> -> vector<8x128xf32>
    %c0_54 = arith.constant 0 : index
    %c0_55 = arith.constant 0 : index
    %122 = vector.load %arg14[%c0_54, %c0_55] : memref<8x128xf32, #tpu.memory_space<vmem>>, vector<8x128xf32>
    tpu.vector_store %arg14[%c0_54, %c0_55], %121 {strides = array<i32>} : memref<8x128xf32, #tpu.memory_space<vmem>>, vector<8x128xf32>,
    return
  }
  func.func @transform_0(%arg0: i32) -> (i32, i32) {
    %c0_i32 = arith.constant 0 : i32
    %c0_i32_0 = arith.constant 0 : i32
    return %arg0, %c0_i32 : i32, i32
  }
  func.func @transform_1(%arg0: i32) -> (i32, i32) {
    %c0_i32 = arith.constant 0 : i32
    %c0_i32_0 = arith.constant 0 : i32
    %c0_i32_1 = arith.constant 0 : i32
    return %c0_i32, %c0_i32_0 : i32, i32
  }
  func.func @transform_2(%arg0: i32) -> (i32, i32) {
    %c0_i32 = arith.constant 0 : i32
    %c0_i32_0 = arith.constant 0 : i32
    %c0_i32_1 = arith.constant 0 : i32
    return %c0_i32, %c0_i32_0 : i32, i32
  }
  func.func @transform_3(%arg0: i32) -> (i32, i32) {
    %c0_i32 = arith.constant 0 : i32
    %c0_i32_0 = arith.constant 0 : i32
    %c0_i32_1 = arith.constant 0 : i32
    return %c0_i32, %c0_i32_0 : i32, i32
  }
  func.func @transform_4(%arg0: i32) -> (i32, i32) {
    %c0_i32 = arith.constant 0 : i32
    %c0_i32_0 = arith.constant 0 : i32
    %c0_i32_1 = arith.constant 0 : i32
    return %c0_i32, %c0_i32_0 : i32, i32
  }
  func.func @transform_5(%arg0: i32) -> (i32, i32) {
    %c0_i32 = arith.constant 0 : i32
    %c0_i32_0 = arith.constant 0 : i32
    %c0_i32_1 = arith.constant 0 : i32
    return %c0_i32, %c0_i32_0 : i32, i32
  }
  func.func @transform_6(%arg0: i32) -> (i32, i32) {
    %c0_i32 = arith.constant 0 : i32
    %c0_i32_0 = arith.constant 0 : i32
    %c0_i32_1 = arith.constant 0 : i32
    return %c0_i32, %c0_i32_0 : i32, i32
  }
  func.func @transform_7(%arg0: i32) -> (i32, i32) {
    %c0_i32 = arith.constant 0 : i32
    %c0_i32_0 = arith.constant 0 : i32
    %c0_i32_1 = arith.constant 0 : i32
    return %c0_i32, %c0_i32_0 : i32, i32
  }
  func.func @transform_8(%arg0: i32) -> (i32, i32) {
    %c0_i32 = arith.constant 0 : i32
    %c0_i32_0 = arith.constant 0 : i32
    %c0_i32_1 = arith.constant 0 : i32
    return %c0_i32, %c0_i32_0 : i32, i32
  }
  func.func @transform_9(%arg0: i32) -> (i32, i32) {
    %c0_i32 = arith.constant 0 : i32
    %c0_i32_0 = arith.constant 0 : i32
    %c0_i32_1 = arith.constant 0 : i32
    return %c0_i32, %c0_i32_0 : i32, i32
  }
  func.func @transform_10(%arg0: i32) -> (i32, i32) {
    %c0_i32 = arith.constant 0 : i32
    %c0_i32_0 = arith.constant 0 : i32
    %c0_i32_1 = arith.constant 0 : i32
    return %c0_i32, %c0_i32_0 : i32, i32
  }
  func.func @transform_11(%arg0: i32) -> (i32, i32) {
    %c0_i32 = arith.constant 0 : i32
    %c0_i32_0 = arith.constant 0 : i32
    %c0_i32_1 = arith.constant 0 : i32
    return %c0_i32, %c0_i32_0 : i32, i32
  }
  func.func @transform_12(%arg0: i32) -> (i32, i32) {
    %c0_i32 = arith.constant 0 : i32
    %c0_i32_0 = arith.constant 0 : i32
    %c0_i32_1 = arith.constant 0 : i32
    return %c0_i32, %c0_i32_0 : i32, i32
  }
  func.func @transform_13(%arg0: i32) -> (i32, i32) {
    %c0_i32 = arith.constant 0 : i32
    %c0_i32_0 = arith.constant 0 : i32
    return %arg0, %c0_i32 : i32, i32
  }
}

</mosaic_0001>

<bundles_post_ra>
// kernel: tpu_custom_call.1
= control target key start
LH: loop header
LB: loop body
LE: loop exit
PB: predicated region body
PF: predicated region fallthrough
CT: control target
= control target key end

     0   :  { %vm96_vm0 = vcmask 261120   ;;  %s928_s14 = smov 96   ;;  %s1181_s0 = inlined_call_operand.vmem [shape: f32[8,128], index: 0, kind: input, shape index: {}]   ;;  %s1182_s1 = inlined_call_operand.vmem [shape: f32[32,64], index: 1, kind: input, shape index: {}]   ;;  %s1183_s2 = inlined_call_operand.vmem [shape: f32[1,64], index: 2, kind: input, shape index: {}]   ;;  %s1184_s3 = inlined_call_operand.vmem [shape: f32[1,64], index: 3, kind: input, shape index: {}]   ;;  %s1185_s4 = inlined_call_operand.vmem [shape: f32[1,64], index: 4, kind: input, shape index: {}]   ;;  %s1186_s5 = inlined_call_operand.vmem [shape: f32[64,128], index: 5, kind: input, shape index: {}]   ;;  %s1187_s6 = inlined_call_operand.vmem [shape: f32[1,128], index: 6, kind: input, shape index: {}]   ;;  %s1188_s7 = inlined_call_operand.vmem [shape: f32[1,128], index: 7, kind: input, shape index: {}]   ;;  %s1189_s8 = inlined_call_operand.vmem [shape: f32[1,128], index: 8, kind: input, shape index: {}]   ;;  %s1190_s9 = inlined_call_operand.vmem [shape: f32[128,32], index: 9, kind: input, shape index: {}]   ;;  %s1191_s10 = inlined_call_operand.vmem [shape: f32[1,32], index: 10, kind: input, shape index: {}]   ;;  %s1192_s11 = inlined_call_operand.vmem [shape: f32[1,32], index: 11, kind: input, shape index: {}]   ;;  %s1193_s12 = inlined_call_operand.vmem [shape: f32[1,32], index: 12, kind: input, shape index: {}]   ;;  %s1194_s13 = inlined_call_operand.hbm [shape: f32[8,128], index: 13, kind: output, shape index: {}]  }
   0x1   :  { %v82_v0 = vld [vmem:[%s1181_s0] sm:$0xff]  ;;  %v48_v1 = vld [vmem:[%s1182_s1 + $0x18] sm:$0xff]  ;;  %v47_v2 = vld [vmem:[%s1182_s1 + $0x10] sm:$0xff] }
   0x2   :  { %84 = vrot.lane.b32.xlu0 %v82_v0, %s928_s14  ;;  %780 = vmatprep.subr.mxu1 %v48_v1 }
   0x3   :  { %18 = vsyncpa [#allocation3], 0  ;;  %s929_s15 = smov 32   ;;  %781 = vmatpush3.msra.mxu1 %v48_v1  ;;  %v46_v3 = vld [vmem:[%s1182_s1 + $0x8] sm:$0xff]  ;;  %788 = vmatprep.mubr.msk.f32.mxu1 %vm96_vm0, %v82_v0  ;;  %v45_v4 = vld [vmem:[%s1182_s1] sm:$0xff]  ;;  %s930_s19 = smov 64  }
   0x4   :  { %88 = vrot.lane.b32.xlu1 %v82_v0, %s929_s15  ;;  %782 = vmatprep.subr.mxu1 %v47_v2  ;;  %v711_v8 = vld [vmem:[%s1183_s2] ss:$0 sm:$0xff]  ;;  %vm190_vm1 = vcmask 523264   ;;  %v59_v41 = vld [vmem:[%s1186_s5 + $0x38] sm:$0xff]  ;;  %v58_v42 = vld [vmem:[%s1186_s5 + $0x30] sm:$0xff]  ;;  %vm694_vm14 = vcmask 785408  }
   0x5   :  { %783 = vmatpush3.msra.mxu1 %v47_v2  ;;  %v57_v43 = vld [vmem:[%s1186_s5 + $0x28] sm:$0xff]  ;;  %v56_v44 = vld [vmem:[%s1186_s5 + $0x20] sm:$0xff]  ;;  %v55_v45 = vld [vmem:[%s1186_s5 + $0x18] sm:$0xff] }
   0x6   :  { %86 = vrot.lane.b32.xlu0 %v82_v0, %s930_s19  ;;  %784 = vmatprep.subr.mxu1 %v46_v3  ;;  %v54_v46 = vld [vmem:[%s1186_s5 + $0x10] sm:$0xff]  ;;  %v53_v47 = vld [vmem:[%s1186_s5 + $0x8] sm:$0xff]  ;;  %v52_v48 = vld [vmem:[%s1186_s5] sm:$0xff] }
   0x7   :  { %785 = vmatpush3.msra.mxu1 %v46_v3  ;;  %v716_v62 = vld [vmem:[%s1184_s3] ss:$0 sm:$0xff] }
   0x8   :  { %786 = vmatprep.subr.mxu1 %v45_v4  ;;  %v717_v1 = vld [vmem:[%s1185_s4] ss:$0 sm:$0xff] }
   0x9   :  { %787 = vmatpush3.msra.mxu1 %v45_v4 }
   0xa   :  { %794 = vmatprep.subr.mxu1 %v59_v41 }
  0x74   :  { %v85_v5 = vpop.permute.xlu0 %84 }
  0x75   :  { %789 = vmatmul.mubr.msk.f32.vlgmr.msra.gmra.mxu1 %vm96_vm0, %v85_v5 }
  0x76   :  { %v89_v6 = vpop.permute.xlu1 %88  ;;  %795 = vmatpush3.msra.mxu1 %v59_v41 }
  0x77   :  { %796 = vmatprep.subr.mxu1 %v58_v42 }
  0x78   :  { %v87_v7 = vpop.permute.xlu0 %86  ;;  %797 = vmatpush3.msra.mxu1 %v58_v42 }
  0x79   :  { %791 = vmatprep.mubr.msk.f32.mxu1 %vm96_vm0, %v87_v7  ;;  %798 = vmatprep.subr.mxu1 %v57_v43 }
  0x7a   :  { %792 = vmatmul.mubr.msk.f32.gmra.mxu1 %vm96_vm0, %v89_v6 }
  0x7b   :  { %799 = vmatpush3.msra.mxu1 %v57_v43 }
  0x7c   :  { %800 = vmatprep.subr.mxu1 %v56_v44 }
  0x7d   :  { %801 = vmatpush3.msra.mxu1 %v56_v44 }
  0x7e   :  { %802 = vmatprep.subr.mxu1 %v55_v45 }
  0x7f   :  { %803 = vmatpush3.msra.mxu1 %v55_v45 }
  0x80   :  { %804 = vmatprep.subr.mxu1 %v54_v46 }
  0x81   :  { %805 = vmatpush3.msra.mxu1 %v54_v46 }
  0x82   :  { %806 = vmatprep.subr.mxu1 %v53_v47 }
  0x83   :  { %807 = vmatpush3.msra.mxu1 %v53_v47 }
  0x84   :  { %808 = vmatprep.subr.mxu1 %v52_v48 }
  0x85   :  { %809 = vmatpush3.msra.mxu1 %v52_v48 }
 0x135   :  { %v790_v9 = vpop.f32.mrf.mxu1 }
 0x136   :  { %v177_v10 = vadd.f32 %v790_v9, %v711_v8 }
 0x137   :  { %v171_v11 = vpop.f32.mrf.mxu1 }
 0x138   :  { %v172_v12 = vadd.f32 %v711_v8, %v171_v11  ;;  %v194_v13 = vsel %vm190_vm1, %v177_v10, 0.0 }
 0x139   :  { %195 = vadd.xlane.f32.xlu0 %v194_v13 }
 0x13a   :  { %v793_v14 = vpop.f32.mrf.mxu1  ;;  %v191_v15 = vsel %vm190_vm1, %v172_v12, 0.0 }
 0x13b   :  { %v187_v16 = vadd.f32 %v793_v14, %v711_v8  ;;  %192 = vadd.xlane.f32.xlu1 %v191_v15 }
 0x13c   :  { %v181_v17 = vpop.f32.mrf.mxu1 }
 0x13d   :  { %v182_v18 = vadd.f32 %v711_v8, %v181_v17  ;;  %v200_v19 = vsel %vm190_vm1, %v187_v16, 0.0 }
 0x13f   :  { %201 = vadd.xlane.f32.xlu1 %v200_v19  ;;  %v197_v20 = vsel %vm190_vm1, %v182_v18, 0.0 }
 0x140   :  { %198 = vadd.xlane.f32.xlu0 %v197_v20 }
 0x1c2   :  { %v196_v21 = vpop.xlane.xlu0 %195 }
 0x1c3   :  { %v205_v22 = vmul.f32 0.015625, %v196_v21 }
 0x1c4   :  { %v193_v23 = vpop.xlane.xlu1 %192 }
 0x1c5   :  { %v1031_v24 = vsub.f32 %v177_v10, %v205_v22  ;;  %v204_v25 = vmul.f32 0.015625, %v193_v23 }
 0x1c7   :  { %v1033_v26 = vsub.f32 %v172_v12, %v204_v25  ;;  %v213_v27 = vmul.f32 %v1031_v24, %v1031_v24 }
 0x1c8   :  { %v202_v28 = vpop.xlane.xlu1 %201 }
 0x1c9   :  { %v207_v29 = vmul.f32 0.015625, %v202_v28  ;;  %v199_v30 = vpop.xlane.xlu0 %198  ;;  %v219_v31 = vsel %vm190_vm1, %v213_v27, 0.0  ;;  %v212_v32 = vmul.f32 %v1033_v26, %v1033_v26 }
 0x1ca   :  { %v206_v33 = vmul.f32 0.015625, %v199_v30  ;;  %220 = vadd.xlane.f32.xlu1 %v219_v31 }
 0x1cb   :  { %v211_v34 = vsub.f32 %v187_v16, %v207_v29  ;;  %v216_v35 = vsel %vm190_vm1, %v212_v32, 0.0 }
 0x1cc   :  { %v210_v36 = vsub.f32 %v182_v18, %v206_v33  ;;  %217 = vadd.xlane.f32.xlu0 %v216_v35 }
 0x1cd   :  { %v215_v37 = vmul.f32 %v211_v34, %v211_v34 }
 0x1ce   :  { %v214_v38 = vmul.f32 %v210_v36, %v210_v36 }
 0x1cf   :  { %v225_v39 = vsel %vm190_vm1, %v215_v37, 0.0 }
 0x1d0   :  { %226 = vadd.xlane.f32.xlu1 %v225_v39  ;;  %v222_v40 = vsel %vm190_vm1, %v214_v38, 0.0  ;;  %v722_v39 = vld [vmem:[%s1187_s6] ss:$0 sm:$0xff] }
 0x1d1   :  { %223 = vadd.xlane.f32.xlu0 %v222_v40 }
 0x253   :  { %v221_v49 = vpop.xlane.xlu1 %220 }
 0x254   :  { %v229_v50 = vmul.f32 0.015625, %v221_v49 }
 0x255   :  { %v218_v51 = vpop.xlane.xlu0 %217 }
 0x256   :  { %v233_v52 = vadd.f32 1e-05, %v229_v50  ;;  %v228_v53 = vmul.f32 0.015625, %v218_v51 }
 0x258   :  { %858 = vrsqrt.f32 %v233_v52  ;;  %v232_v54 = vadd.f32 1e-05, %v228_v53 }
 0x259   :  { %v227_v55 = vpop.xlane.xlu1 %226 }
 0x25a   :  { %860 = vrsqrt.f32 %v232_v54  ;;  %v231_v56 = vmul.f32 0.015625, %v227_v55  ;;  %v224_v57 = vpop.xlane.xlu0 %223 }
 0x25b   :  { %v230_v58 = vmul.f32 0.015625, %v224_v57 }
 0x25c   :  { %v235_v59 = vadd.f32 1e-05, %v231_v56 }
 0x25d   :  { %v234_v60 = vadd.f32 1e-05, %v230_v58 }
 0x25e   :  { %862 = vrsqrt.f32 %v235_v59 }
 0x25f   :  { %864 = vrsqrt.f32 %v234_v60 }
 0x265   :  { %v859_v61 = vpop.eup %858 }
 0x266   :  { %v241_v63 = vmul.f32 %v859_v61, %v1031_v24 }
 0x267   :  { %v861_v0 = vpop.eup %860 }
 0x268   :  { %v251_v2 = vmul.f32 %v716_v62, %v241_v63  ;;  %v240_v3 = vmul.f32 %v861_v0, %v1033_v26  ;;  %v78_v0 = vld [vmem:[%s1190_s9 + $0x78] sm:$0xff] }
 0x269   :  { %816 = vmatprep.subr.mxu0 %v78_v0 }
 0x26a   :  { %v250_v4 = vmul.f32 %v716_v62, %v240_v3  ;;  %v261_v5 = vadd.f32 %v717_v1, %v251_v2  ;;  %817 = vmatpush3.msra.mxu0 %v78_v0  ;;  %v76_v2 = vld [vmem:[%s1190_s9 + $0x68] sm:$0xff]  ;;  %v75_v3 = vld [vmem:[%s1190_s9 + $0x60] sm:$0xff] }
 0x26b   :  { %v863_v6 = vpop.eup %862 }
 0x26c   :  { %v865_v7 = vpop.eup %864  ;;  %v243_v8 = vmul.f32 %v863_v6, %v211_v34  ;;  %v260_v9 = vadd.f32 %v717_v1, %v250_v4  ;;  %v270_v10 = vmul.f32 1.442695, %v261_v5  ;;  %vm265_vm2 = vcmp.gt.f32.partialorder %v261_v5, 0.0  ;;  %v74_v4 = vld [vmem:[%s1190_s9 + $0x58] sm:$0xff]  ;;  %v72_v6 = vld [vmem:[%s1190_s9 + $0x48] sm:$0xff] }
 0x26d   :  { %v242_v11 = vmul.f32 %v865_v7, %v210_v36  ;;  %v71_v7 = vld [vmem:[%s1190_s9 + $0x40] sm:$0xff] }
 0x26e   :  { %v268_v12 = vmul.f32 1.442695, %v260_v9  ;;  %866 = vpow2.f32 %v270_v10  ;;  %v253_v13 = vmul.f32 %v716_v62, %v243_v8  ;;  %vm264_vm3 = vcmp.gt.f32.partialorder %v260_v9, 0.0  ;;  %v70_v8 = vld [vmem:[%s1190_s9 + $0x38] sm:$0xff]  ;;  %v68_v10 = vld [vmem:[%s1190_s9 + $0x28] sm:$0xff] }
 0x26f   :  { %v252_v14 = vmul.f32 %v716_v62, %v242_v11  ;;  %v67_v11 = vld [vmem:[%s1190_s9 + $0x20] sm:$0xff] }
 0x270   :  { %868 = vpow2.f32 %v268_v12  ;;  %v263_v15 = vadd.f32 %v717_v1, %v253_v13  ;;  %v66_v12 = vld [vmem:[%s1190_s9 + $0x18] sm:$0xff]  ;;  %v65_v13 = vld [vmem:[%s1190_s9 + $0x10] sm:$0xff] }
 0x271   :  { %v262_v16 = vadd.f32 %v717_v1, %v252_v14  ;;  %v77_v1 = vld [vmem:[%s1190_s9 + $0x70] sm:$0xff]  ;;  %v64_v14 = vld [vmem:[%s1190_s9 + $0x8] sm:$0xff] }
 0x272   :  { %v274_v17 = vmul.f32 1.442695, %v263_v15  ;;  %vm267_vm4 = vcmp.gt.f32.partialorder %v263_v15, 0.0  ;;  %818 = vmatprep.subr.mxu0 %v77_v1 }
 0x273   :  { %v272_v18 = vmul.f32 1.442695, %v262_v16  ;;  %vm266_vm5 = vcmp.gt.f32.partialorder %v262_v16, 0.0  ;;  %819 = vmatpush3.msra.mxu0 %v77_v1 }
 0x274   :  { %870 = vpow2.f32 %v274_v17  ;;  %820 = vmatprep.subr.mxu0 %v76_v2 }
 0x275   :  { %872 = vpow2.f32 %v272_v18  ;;  %821 = vmatpush3.msra.mxu0 %v76_v2 }
 0x276   :  { %822 = vmatprep.subr.mxu0 %v75_v3 }
 0x277   :  { %823 = vmatpush3.msra.mxu0 %v75_v3 }
 0x278   :  { %824 = vmatprep.subr.mxu0 %v74_v4 }
 0x279   :  { %825 = vmatpush3.msra.mxu0 %v74_v4 }
 0x27b   :  { %v867_v19 = vpop.eup %866 }
 0x27c   :  { %v719_v20 = vadd.f32 -1.0, %v867_v19 }
 0x27d   :  { %v869_v21 = vpop.eup %868 }
 0x27e   :  { %v718_v22 = vadd.f32 -1.0, %v869_v21  ;;  %v281_v23 = vmul.f32 1.6732632, %v719_v20 }
 0x280   :  { %v280_v24 = vmul.f32 1.6732632, %v718_v22  ;;  %v285_v26 = vsel %vm265_vm2, %v261_v5, %v281_v23  ;;  %v73_v5 = vld [vmem:[%s1190_s9 + $0x50] sm:$0xff] }
 0x281   :  { %v871_v25 = vpop.eup %870  ;;  %v289_v32 = vmul.f32 1.050701, %v285_v26  ;;  %826 = vmatprep.subr.mxu0 %v73_v5 }
 0x282   :  { %v873_v27 = vpop.eup %872  ;;  %v284_v28 = vsel %vm264_vm3, %v260_v9, %v280_v24  ;;  %v721_v29 = vadd.f32 -1.0, %v871_v25  ;;  %827 = vmatpush3.msra.mxu0 %v73_v5  ;;  %v69_v9 = vld [vmem:[%s1190_s9 + $0x30] sm:$0xff] }
 0x283   :  { %v288_v30 = vmul.f32 1.050701, %v284_v28  ;;  %v720_v31 = vadd.f32 -1.0, %v873_v27  ;;  %828 = vmatprep.subr.mxu0 %v72_v6 }
 0x284   :  { %v283_v33 = vmul.f32 1.6732632, %v721_v29  ;;  %829 = vmatpush3.msra.mxu0 %v72_v6  ;;  %v727_v29 = vld [vmem:[%s1188_s7] ss:$0 sm:$0xff] }
 0x285   :  { %810 = vmatprep.mubr.msk.f32.mxu1 %vm190_vm1, %v288_v30  ;;  %v282_v34 = vmul.f32 1.6732632, %v720_v31  ;;  %830 = vmatprep.subr.mxu0 %v71_v7  ;;  %v733_v6 = vld [vmem:[%s1191_s10] ss:$0 sm:$0xff] }
 0x286   :  { %811 = vmatmul.mubr.msk.f32.vlgmr.msra.gmra.mxu1 %vm190_vm1, %v289_v32  ;;  %v287_v35 = vsel %vm267_vm4, %v263_v15, %v283_v33  ;;  %831 = vmatpush3.msra.mxu0 %v71_v7  ;;  %v63_v15 = vld [vmem:[%s1190_s9] sm:$0xff] }
 0x287   :  { %v286_v36 = vsel %vm266_vm5, %v262_v16, %v282_v34  ;;  %v291_v38 = vmul.f32 1.050701, %v287_v35  ;;  %832 = vmatprep.subr.mxu0 %v70_v8  ;;  %v728_v32 = vld [vmem:[%s1189_s8] ss:$0 sm:$0xff] }
 0x288   :  { %v290_v37 = vmul.f32 1.050701, %v286_v36  ;;  %833 = vmatpush3.msra.mxu0 %v70_v8 }
 0x289   :  { %834 = vmatprep.subr.mxu0 %v69_v9 }
 0x28a   :  { %813 = vmatprep.mubr.msk.f32.mxu1 %vm190_vm1, %v290_v37  ;;  %835 = vmatpush3.msra.mxu0 %v69_v9 }
 0x28b   :  { %814 = vmatmul.mubr.msk.f32.gmra.mxu1 %vm190_vm1, %v291_v38  ;;  %836 = vmatprep.subr.mxu0 %v68_v10 }
 0x28c   :  { %837 = vmatpush3.msra.mxu0 %v68_v10 }
 0x28d   :  { %838 = vmatprep.subr.mxu0 %v67_v11 }
 0x28e   :  { %839 = vmatpush3.msra.mxu0 %v67_v11 }
 0x28f   :  { %840 = vmatprep.subr.mxu0 %v66_v12 }
 0x290   :  { %841 = vmatpush3.msra.mxu0 %v66_v12 }
 0x291   :  { %842 = vmatprep.subr.mxu0 %v65_v13 }
 0x292   :  { %843 = vmatpush3.msra.mxu0 %v65_v13 }
 0x293   :  { %844 = vmatprep.subr.mxu0 %v64_v14 }
 0x294   :  { %845 = vmatpush3.msra.mxu0 %v64_v14 }
 0x295   :  { %846 = vmatprep.subr.mxu0 %v63_v15 }
 0x296   :  { %847 = vmatpush3.msra.mxu0 %v63_v15 }
 0x346   :  { %v812_v40 = vpop.f32.mrf.mxu1 }
 0x347   :  { %v382_v41 = vadd.f32 %v812_v40, %v722_v39 }
 0x348   :  { %v376_v42 = vpop.f32.mrf.mxu1 }
 0x349   :  { %v377_v43 = vadd.f32 %v722_v39, %v376_v42  ;;  %397 = vadd.xlane.f32.xlu1 %v382_v41 }
 0x34b   :  { %395 = vadd.xlane.f32.xlu0 %v377_v43  ;;  %v815_v44 = vpop.f32.mrf.mxu1 }
 0x34c   :  { %v392_v45 = vadd.f32 %v815_v44, %v722_v39 }
 0x34d   :  { %v386_v46 = vpop.f32.mrf.mxu1 }
 0x34e   :  { %v387_v47 = vadd.f32 %v722_v39, %v386_v46  ;;  %401 = vadd.xlane.f32.xlu1 %v392_v45 }
 0x350   :  { %399 = vadd.xlane.f32.xlu0 %v387_v47 }
 0x3d2   :  { %v398_v48 = vpop.xlane.xlu1 %397 }
 0x3d3   :  { %v405_v49 = vmul.f32 0.0078125, %v398_v48 }
 0x3d4   :  { %v396_v50 = vpop.xlane.xlu0 %395 }
 0x3d5   :  { %v1082_v51 = vsub.f32 %v382_v41, %v405_v49  ;;  %v404_v52 = vmul.f32 0.0078125, %v396_v50 }
 0x3d7   :  { %v1084_v53 = vsub.f32 %v377_v43, %v404_v52  ;;  %v402_v54 = vpop.xlane.xlu1 %401  ;;  %v413_v55 = vmul.f32 %v1082_v51, %v1082_v51 }
 0x3d8   :  { %v407_v56 = vmul.f32 0.0078125, %v402_v54 }
 0x3d9   :  { %v400_v57 = vpop.xlane.xlu0 %399  ;;  %418 = vadd.xlane.f32.xlu1 %v413_v55  ;;  %v412_v58 = vmul.f32 %v1084_v53, %v1084_v53 }
 0x3da   :  { %v1090_v59 = vsub.f32 %v392_v45, %v407_v56  ;;  %v406_v60 = vmul.f32 0.0078125, %v400_v57 }
 0x3db   :  { %416 = vadd.xlane.f32.xlu0 %v412_v58 }
 0x3dc   :  { %v1092_v61 = vsub.f32 %v387_v47, %v406_v60  ;;  %v415_v62 = vmul.f32 %v1090_v59, %v1090_v59 }
 0x3de   :  { %422 = vadd.xlane.f32.xlu1 %v415_v62  ;;  %v414_v63 = vmul.f32 %v1092_v61, %v1092_v61 }
 0x3e0   :  { %420 = vadd.xlane.f32.xlu0 %v414_v63 }
 0x462   :  { %v419_v16 = vpop.xlane.xlu1 %418 }
 0x463   :  { %v425_v17 = vmul.f32 0.0078125, %v419_v16 }
 0x464   :  { %v417_v18 = vpop.xlane.xlu0 %416 }
 0x465   :  { %v429_v19 = vadd.f32 1e-05, %v425_v17  ;;  %v424_v20 = vmul.f32 0.0078125, %v417_v18 }
 0x467   :  { %874 = vrsqrt.f32 %v429_v19  ;;  %v428_v21 = vadd.f32 1e-05, %v424_v20  ;;  %v423_v22 = vpop.xlane.xlu1 %422 }
 0x468   :  { %v427_v23 = vmul.f32 0.0078125, %v423_v22 }
 0x469   :  { %876 = vrsqrt.f32 %v428_v21  ;;  %v421_v24 = vpop.xlane.xlu0 %420 }
 0x46a   :  { %v431_v25 = vadd.f32 1e-05, %v427_v23  ;;  %v426_v26 = vmul.f32 0.0078125, %v421_v24 }
 0x46c   :  { %878 = vrsqrt.f32 %v431_v25  ;;  %v430_v27 = vadd.f32 1e-05, %v426_v26 }
 0x46e   :  { %880 = vrsqrt.f32 %v430_v27 }
 0x474   :  { %v875_v28 = vpop.eup %874 }
 0x475   :  { %v437_v30 = vmul.f32 %v875_v28, %v1082_v51 }
 0x476   :  { %v877_v31 = vpop.eup %876 }
 0x477   :  { %v436_v33 = vmul.f32 %v877_v31, %v1084_v53  ;;  %v447_v34 = vmul.f32 %v727_v29, %v437_v30 }
 0x479   :  { %v879_v35 = vpop.eup %878  ;;  %v446_v36 = vmul.f32 %v727_v29, %v436_v33  ;;  %v457_v37 = vadd.f32 %v728_v32, %v447_v34 }
 0x47a   :  { %v439_v38 = vmul.f32 %v879_v35, %v1090_v59 }
 0x47b   :  { %v881_v39 = vpop.eup %880  ;;  %v456_v40 = vadd.f32 %v728_v32, %v446_v36  ;;  %v466_v41 = vmul.f32 1.442695, %v457_v37  ;;  %vm461_vm6 = vcmp.gt.f32.partialorder %v457_v37, 0.0 }
 0x47c   :  { %v438_v42 = vmul.f32 %v881_v39, %v1092_v61  ;;  %v449_v43 = vmul.f32 %v727_v29, %v439_v38 }
 0x47d   :  { %v464_v44 = vmul.f32 1.442695, %v456_v40  ;;  %882 = vpow2.f32 %v466_v41  ;;  %vm460_vm7 = vcmp.gt.f32.partialorder %v456_v40, 0.0 }
 0x47e   :  { %v448_v45 = vmul.f32 %v727_v29, %v438_v42  ;;  %v459_v46 = vadd.f32 %v728_v32, %v449_v43 }
 0x47f   :  { %884 = vpow2.f32 %v464_v44 }
 0x480   :  { %v458_v47 = vadd.f32 %v728_v32, %v448_v45  ;;  %v470_v48 = vmul.f32 1.442695, %v459_v46  ;;  %vm463_vm8 = vcmp.gt.f32.partialorder %v459_v46, 0.0 }
 0x482   :  { %v468_v49 = vmul.f32 1.442695, %v458_v47  ;;  %886 = vpow2.f32 %v470_v48  ;;  %vm462_vm9 = vcmp.gt.f32.partialorder %v458_v47, 0.0 }
 0x484   :  { %888 = vpow2.f32 %v468_v49 }
 0x48a   :  { %v883_v50 = vpop.eup %882 }
 0x48b   :  { %v730_v51 = vadd.f32 -1.0, %v883_v50 }
 0x48c   :  { %v885_v52 = vpop.eup %884 }
 0x48d   :  { %v729_v53 = vadd.f32 -1.0, %v885_v52  ;;  %v477_v54 = vmul.f32 1.6732632, %v730_v51  ;;  %v734_v52 = vld [vmem:[%s1192_s11] ss:$0 sm:$0xff]  ;;  %s931_s11 = smov [#allocation2]  }
 0x48f   :  { %v887_v55 = vpop.eup %886  ;;  %v476_v56 = vmul.f32 1.6732632, %v729_v53  ;;  %v481_v57 = vsel %vm461_vm6, %v457_v37, %v477_v54  ;;  %v735_v54 = vld [vmem:[%s1193_s12] ss:$0 sm:$0xff]  ;;  %s703_s12 = sshll.u32 %s931_s11, 4  ;;  %s704_s12 = int_to_ptr.vmem [resolvable:$true] %s703_s12 }
 0x490   :  { %v732_v58 = vadd.f32 -1.0, %v887_v55  ;;  %v485_v0 = vmul.f32 1.050701, %v481_v57  ;;  %p911_p1 = scmp.lt.s32.totalorder %s704_s12, %s704_s12 }
 0x491   :  { %v889_v59 = vpop.eup %888  ;;  %v480_v60 = vsel %vm460_vm7, %v456_v40, %v476_v56 }
 0x492   :  { %v484_v61 = vmul.f32 1.050701, %v480_v60  ;;  %v731_v62 = vadd.f32 -1.0, %v889_v59  ;;  %v479_v63 = vmul.f32 1.6732632, %v732_v58 }
 0x494   :  { %848 = vmatprep.mubr.f32.mxu0 %v484_v61  ;;  %v478_v1 = vmul.f32 1.6732632, %v731_v62  ;;  %v483_v2 = vsel %vm463_vm8, %v459_v46, %v479_v63 }
 0x495   :  { %849 = vmatmul.mubr.f32.vlgmr.msra.gmra.mxu0 %v485_v0  ;;  %v487_v5 = vmul.f32 1.050701, %v483_v2 }
 0x496   :  { %v482_v3 = vsel %vm462_vm9, %v458_v47, %v478_v1 }
 0x497   :  { %v486_v4 = vmul.f32 1.050701, %v482_v3 }
 0x499   :  { %851 = vmatprep.mubr.f32.mxu0 %v486_v4 }
 0x49a   :  { %852 = vmatmul.mubr.f32.gmra.mxu0 %v487_v5 }
 0x555   :  { %v850_v7 = vpop.f32.mrf.mxu0 }
 0x556   :  { %v566_v8 = vadd.f32 %v850_v7, %v733_v6 }
 0x557   :  { %v560_v9 = vpop.f32.mrf.mxu0 }
 0x558   :  { %v582_v10 = vsel %vm96_vm0, %v566_v8, 0.0  ;;  %v561_v16 = vadd.f32 %v733_v6, %v560_v9 }
 0x559   :  { %583 = vadd.xlane.f32.xlu0 %v582_v10 }
 0x55a   :  { %v853_v11 = vpop.f32.mrf.mxu0  ;;  %v579_v18 = vsel %vm96_vm0, %v561_v16, 0.0 }
 0x55b   :  { %v576_v12 = vadd.f32 %v853_v11, %v733_v6 }
 0x55c   :  { %v570_v13 = vpop.f32.mrf.mxu0 }
 0x55d   :  { %v571_v14 = vadd.f32 %v733_v6, %v570_v13  ;;  %v588_v15 = vsel %vm96_vm0, %v576_v12, 0.0 }
 0x55e   :  { %589 = vadd.xlane.f32.xlu0 %v588_v15 }
 0x55f   :  { %v585_v17 = vsel %vm96_vm0, %v571_v14, 0.0 }
 0x560   :  { %586 = vadd.xlane.f32.xlu1 %v585_v17 }
 0x564   :  { %580 = vadd.xlane.f32.xlu1 %v579_v18 }
 0x5e2   :  { %v584_v19 = vpop.xlane.xlu0 %583 }
 0x5e3   :  { %v593_v20 = vmul.f32 0.03125, %v584_v19 }
 0x5e5   :  { %v597_v21 = vsub.f32 %v566_v8, %v593_v20 }
 0x5e7   :  { %v590_v22 = vpop.xlane.xlu0 %589  ;;  %v601_v23 = vmul.f32 %v597_v21, %v597_v21 }
 0x5e8   :  { %v595_v24 = vmul.f32 0.03125, %v590_v22 }
 0x5e9   :  { %v587_v25 = vpop.xlane.xlu1 %586  ;;  %v607_v26 = vsel %vm96_vm0, %v601_v23, 0.0 }
 0x5ea   :  { %v599_v27 = vsub.f32 %v576_v12, %v595_v24  ;;  %v594_v28 = vmul.f32 0.03125, %v587_v25  ;;  %608 = vadd.xlane.f32.xlu0 %v607_v26 }
 0x5ec   :  { %v598_v29 = vsub.f32 %v571_v14, %v594_v28  ;;  %v603_v30 = vmul.f32 %v599_v27, %v599_v27 }
 0x5ed   :  { %v581_v31 = vpop.xlane.xlu1 %580 }
 0x5ee   :  { %v592_v32 = vmul.f32 0.03125, %v581_v31  ;;  %v613_v33 = vsel %vm96_vm0, %v603_v30, 0.0  ;;  %v602_v34 = vmul.f32 %v598_v29, %v598_v29 }
 0x5ef   :  { %614 = vadd.xlane.f32.xlu0 %v613_v33 }
 0x5f0   :  { %v596_v35 = vsub.f32 %v561_v16, %v592_v32  ;;  %v610_v36 = vsel %vm96_vm0, %v602_v34, 0.0 }
 0x5f1   :  { %611 = vadd.xlane.f32.xlu1 %v610_v36 }
 0x5f2   :  { %v600_v37 = vmul.f32 %v596_v35, %v596_v35 }
 0x5f4   :  { %v604_v38 = vsel %vm96_vm0, %v600_v37, 0.0 }
 0x5f5   :  { %605 = vadd.xlane.f32.xlu1 %v604_v38 }
 0x673   :  { %v609_v39 = vpop.xlane.xlu0 %608 }
 0x674   :  { %v617_v40 = vmul.f32 0.03125, %v609_v39 }
 0x676   :  { %v621_v41 = vadd.f32 1e-05, %v617_v40 }
 0x678   :  { %890 = vrsqrt.f32 %v621_v41  ;;  %v615_v42 = vpop.xlane.xlu0 %614 }
 0x679   :  { %v619_v43 = vmul.f32 0.03125, %v615_v42 }
 0x67a   :  { %v612_v44 = vpop.xlane.xlu1 %611 }
 0x67b   :  { %v623_v45 = vadd.f32 1e-05, %v619_v43  ;;  %v618_v46 = vmul.f32 0.03125, %v612_v44 }
 0x67d   :  { %892 = vrsqrt.f32 %v623_v45  ;;  %v622_v47 = vadd.f32 1e-05, %v618_v46 }
 0x67e   :  { %v606_v48 = vpop.xlane.xlu1 %605 }
 0x67f   :  { %894 = vrsqrt.f32 %v622_v47  ;;  %v616_v49 = vmul.f32 0.03125, %v606_v48 }
 0x681   :  { %v620_v50 = vadd.f32 1e-05, %v616_v49 }
 0x683   :  { %896 = vrsqrt.f32 %v620_v50 }
 0x685   :  { %v891_v51 = vpop.eup %890 }
 0x686   :  { %v629_v53 = vmul.f32 %v891_v51, %v597_v21 }
 0x688   :  { %v639_v55 = vmul.f32 %v734_v52, %v629_v53 }
 0x68a   :  { %v893_v56 = vpop.eup %892  ;;  %v649_v57 = vadd.f32 %v735_v54, %v639_v55 }
 0x68b   :  { %v631_v58 = vmul.f32 %v893_v56, %v599_v27 }
 0x68c   :  { %v895_v59 = vpop.eup %894  ;;  %v658_v60 = vmul.f32 1.442695, %v649_v57  ;;  %vm653_vm10 = vcmp.gt.f32.partialorder %v649_v57, 0.0 }
 0x68d   :  { %v630_v61 = vmul.f32 %v895_v59, %v598_v29  ;;  %v641_v62 = vmul.f32 %v734_v52, %v631_v58 }
 0x68e   :  { %898 = vpow2.f32 %v658_v60 }
 0x68f   :  { %v640_v63 = vmul.f32 %v734_v52, %v630_v61  ;;  %v651_v0 = vadd.f32 %v735_v54, %v641_v62 }
 0x690   :  { %v897_v1 = vpop.eup %896 }
 0x691   :  { %v650_v2 = vadd.f32 %v735_v54, %v640_v63  ;;  %v662_v3 = vmul.f32 1.442695, %v651_v0  ;;  %v628_v4 = vmul.f32 %v897_v1, %v596_v35  ;;  %vm655_vm12 = vcmp.gt.f32.partialorder %v651_v0, 0.0 }
 0x693   :  { %v660_v5 = vmul.f32 1.442695, %v650_v2  ;;  %900 = vpow2.f32 %v662_v3  ;;  %v638_v6 = vmul.f32 %v734_v52, %v628_v4  ;;  %vm654_vm11 = vcmp.gt.f32.partialorder %v650_v2, 0.0 }
 0x695   :  { %902 = vpow2.f32 %v660_v5  ;;  %v648_v7 = vadd.f32 %v735_v54, %v638_v6 }
 0x697   :  { %v656_v23 = vmul.f32 1.442695, %v648_v7  ;;  %vm652_vm13 = vcmp.gt.f32.partialorder %v648_v7, 0.0 }
 0x699   :  { %904 = vpow2.f32 %v656_v23 }
 0x69b   :  { %v899_v8 = vpop.eup %898 }
 0x69c   :  { %v737_v9 = vadd.f32 -1.0, %v899_v8 }
 0x69e   :  { %v669_v10 = vmul.f32 1.6732632, %v737_v9 }
 0x6a0   :  { %v901_v11 = vpop.eup %900  ;;  %v673_v12 = vsel %vm653_vm10, %v649_v57, %v669_v10 }
 0x6a1   :  { %v677_v13 = vmul.f32 1.050701, %v673_v12  ;;  %v739_v14 = vadd.f32 -1.0, %v901_v11 }
 0x6a2   :  { %v903_v15 = vpop.eup %902 }
 0x6a3   :  { %681 = vrot.lane.b32.xlu0 %v677_v13, %s929_s15  ;;  %v738_v16 = vadd.f32 -1.0, %v903_v15  ;;  %v671_v18 = vmul.f32 1.6732632, %v739_v14 }
 0x6a5   :  { %v670_v17 = vmul.f32 1.6732632, %v738_v16  ;;  %v675_v21 = vsel %vm655_vm12, %v651_v0, %v671_v18 }
 0x6a6   :  { %v679_v22 = vmul.f32 1.050701, %v675_v21  ;;  %v905_v24 = vpop.eup %904 }
 0x6a7   :  { %v674_v19 = vsel %vm654_vm11, %v650_v2, %v670_v17  ;;  %v736_v25 = vadd.f32 -1.0, %v905_v24 }
 0x6a8   :  { %v678_v20 = vmul.f32 1.050701, %v674_v19 }
 0x6a9   :  { %v668_v26 = vmul.f32 1.6732632, %v736_v25 }
 0x6aa   :  { %685 = vrot.lane.b32.xlu1 %v678_v20, %s930_s19 }
 0x6ab   :  { %v672_v27 = vsel %vm652_vm13, %v648_v7, %v668_v26 }
 0x6ac   :  { %v676_v30 = vmul.f32 1.050701, %v672_v27 }
 0x6ae   :  { %689 = vrot.lane.b32.xlu1 %v679_v22, %s928_s14  ;;  %s906_s14 = scalar_lea.vmem %s704_s12, 128 }
 0x6af   :  { %p907_p0 = scmp.ne.s32.totalorder %s704_s12, %s906_s14  ;;  %p912_p2 = scmp.lt.s32.totalorder %s906_s14, %s906_s14 }
 0x6b1   :  { %p913_p3 = por %p912_p2, %p911_p1 }
 0x6b3   :  { %p914_p4 = pnand %p913_p3, %p907_p0 }
 0x715   :  { %v682_v28 = vpop.permute.xlu0 %681 }
 0x716   :  { %v692_v31 = vsel %vm96_vm0, %v676_v30, %v682_v28 }
 0x71c   :  { %v686_v29 = vpop.permute.xlu1 %685 }
 0x71d   :  { %v693_v32 = vsel %vm190_vm1, %v692_v31, %v686_v29 }
 0x720   :  { %v690_v33 = vpop.permute.xlu1 %689 }
 0x721   :  { %v695_v34 = vsel %vm694_vm14, %v693_v32, %v690_v33 }
 0x722   :  { %696 = vst [vmem:[#allocation2] sm:$0xff] %v695_v34 }
 0x723   :  { %917 = shalt.err (!%p914_p4)
}
 0x724   :  { %706 = dma.vmem_to_hbm [thread:$0]  %s704_s12, 128, %s1194_s13, [#allocation3]  }
 0x725   :  { %926 = dma.done.wait [#allocation3], 128  }
 0x726   :  { %927 = vsyncadd [#allocation3], 4294967168 }
 0x727   :  { %710 = vsyncpa [#allocation3], 1 }

</bundles_post_ra>
